<compile_context>
chip_gen: v6e
topology: v6e:2x2x1
jax: 0.10.0
libtpu: 0.0.40
codegen_flags: <defaults>
</compile_context>

<pallas_src>
import functools

import jax
import jax.numpy as jnp
from jax import lax
from jax.experimental import pallas as pl
from jax.experimental.pallas import tpu as pltpu


def _round_up(x: int, m: int) -> int:
    return (x + m - 1) // m * m


def _pad2d(a, rows, cols):
    r, c = a.shape
    if r == rows and c == cols:
        return a
    return jnp.pad(a, ((0, rows - r), (0, cols - c)))


def _make_rc_kernel(leak: float, gamma: float):
    c_lin = (leak - 1.0) / gamma          # coefficient on r
    c_tanh = (1.0 - leak) / gamma         # coefficient on tanh(...)

    def rc_kernel(w_ref, x_ref, r_ref, out_ref):
        # Single fused MXU matmul: [Win | A | b] @ [p; r; 1], f32 accumulation.
        pre = jnp.dot(w_ref[...], x_ref[...],
                      preferred_element_type=jnp.float32)
        # Leaky-integration combine + tanh in f32 (VPU/EUP), lane-dense store.
        out_ref[...] = (c_lin * r_ref[...] + c_tanh * jnp.tanh(pre)).astype(
            out_ref.dtype)

    return rc_kernel


def rc_control_forward(Win, A, leak, b, gamma, p, r, *,
                       block_n: int = 128, block_k: int = 128,
                       compute_dtype=jnp.bfloat16):
    """Pallas equivalent of RC_control.forward given the already-evaluated
    control signal p = concat_i csp[i].fit(t)  (shape (M, K)).

    K is the number of batched RHS evaluations (time samples / trajectories);
    batch it to >=128 so stores are lane-dense and launch overhead amortizes.
    """
    N, M = Win.shape
    K = r.shape[1]
    assert A.shape == (N, N) and p.shape == (M, K) and b.shape == (N, 1)
    assert block_n % 8 == 0 and block_k % 128 == 0

    # --- Fuse [Win | A | bias] into one weight matrix, [p; r; ones] into one rhs.
    C = M + N + 1
    W_cat = jnp.concatenate(
        [Win.astype(jnp.float32), A.astype(jnp.float32), b.astype(jnp.float32)],
        axis=1)                                                        # (N, C)
    ones = jnp.ones((1, K), jnp.float32)
    x_cat = jnp.concatenate(
        [p.astype(jnp.float32), r.astype(jnp.float32), ones], axis=0)  # (C, K)

    # --- Pad to tile multiples (zero padding cannot change the result; padded
    #     rows/cols are sliced off at the end).
    N_pad = _round_up(N, block_n)
    K_pad = _round_up(K, block_k)
    C_pad = _round_up(C, 8)          # sublane-friendly contraction length

    W_cat = _pad2d(W_cat, N_pad, C_pad).astype(compute_dtype)
    x_cat = _pad2d(x_cat, C_pad, K_pad).astype(compute_dtype)
    r_pad = _pad2d(r.astype(jnp.float32), N_pad, K_pad)

    grid = (N_pad // block_n, K_pad // block_k)

    # Double-buffered block footprint + headroom; cap at 64 MiB (v7x VMEM).
    item = jnp.dtype(compute_dtype).itemsize
    blk_bytes = (block_n * C_pad + C_pad * block_k) * item \
        + 2 * block_n * block_k * 4
    vmem_limit = int(min(max(4 * blk_bytes, 16 * 1024 * 1024), 64 * 1024 * 1024))

    kernel = _make_rc_kernel(float(leak), float(gamma))

    out = pl.pallas_call(
        kernel,
        out_shape=jax.ShapeDtypeStruct((N_pad, K_pad), jnp.float32),
        grid_spec=pltpu.PrefetchScalarGridSpec(
            num_scalar_prefetch=0,
            grid=grid,
            in_specs=[
                # Weights: block index constant along the inner K axis
                # -> Win/A/b stay resident in VMEM while p/r stream.
                pl.BlockSpec((block_n, C_pad), lambda i, j: (i, 0)),
                pl.BlockSpec((C_pad, block_k), lambda i, j: (0, j)),
                pl.BlockSpec((block_n, block_k), lambda i, j: (i, j)),
            ],
            out_specs=pl.BlockSpec((block_n, block_k), lambda i, j: (i, j)),
        ),
        compiler_params=pltpu.CompilerParams(
            dimension_semantics=("parallel", "parallel"),
            vmem_limit_bytes=vmem_limit,
        ),
    )(W_cat, x_cat, r_pad)

    return out[:N, :K]


def eval_control_signal(coeffs, t):
    """Deterministic stand-in for [csp[i].fit(t) for i in range(M)] -> (M, K).

    Each "spline" i is a cubic polynomial with coefficients coeffs[i] = (c0..c3)
    evaluated at the K time points in t.
    """
    # TODO(synk): the original csp objects are externally fitted cubic splines
    # (scipy/torch objects) with no Pallas equivalent; replaced by fixed cubic
    # polynomials evaluated in plain JAX glue.
    powers = jnp.stack([jnp.ones_like(t), t, t ** 2, t ** 3], axis=0)  # (4, K)
    return coeffs @ powers                                             # (M, K)


def rc_control_reference(Win, A, leak, b, gamma, p, r,
                         matmul_dtype=jnp.float32):
    """Pure-JAX reference of the torch forward (f32 accumulate, f32 combine)."""
    dot = functools.partial(jnp.dot, preferred_element_type=jnp.float32,
                            precision=lax.Precision.HIGHEST)
    Win_c = Win.astype(matmul_dtype)
    A_c = A.astype(matmul_dtype)
    p_c = p.astype(matmul_dtype)
    r_c = r.astype(matmul_dtype)
    b_c = b.astype(matmul_dtype).astype(jnp.float32)
    pre = dot(Win_c, p_c) + dot(A_c, r_c) + b_c
    return ((leak - 1.0) / gamma) * r + ((1.0 - leak) / gamma) * jnp.tanh(pre)


if __name__ == "__main__":
    # Reservoir N=128 nodes, M=8 control channels, K=256 batched RHS columns
    # (lane-dense: K is a multiple of 128).
    N, M, K = 128, 8, 256
    leak = 0.1
    dt = 0.02   # == gamma in the torch module

    key = jax.random.PRNGKey(0)
    k_win, k_a, k_b, k_r, k_c = jax.random.split(key, 5)

    Win = jax.random.normal(k_win, (N, M), dtype=jnp.float32) * 0.5
    A = jax.random.normal(k_a, (N, N), dtype=jnp.float32) / jnp.sqrt(N)
    b = jax.random.normal(k_b, (N, 1), dtype=jnp.float32) * 0.1
    r = jax.random.normal(k_r, (N, K), dtype=jnp.float32)

    # Deterministic "spline" coefficients and time points.
    coeffs = jax.random.normal(k_c, (M, 4), dtype=jnp.float32) * 0.3
    t = jnp.linspace(0.0, 1.0, K, dtype=jnp.float32)
    p = eval_control_signal(coeffs, t)          # (M, K)

    # Exact f32 path (matches torch semantics bit-for-bit up to accumulation order).
    out_f32 = jax.block_until_ready(
        rc_control_forward(Win, A, leak, b, dt, p, r,
                           compute_dtype=jnp.float32))
    ref_f32 = rc_control_reference(Win, A, leak, b, dt, p, r, jnp.float32)
    assert out_f32.shape == (N, K)
    assert jnp.allclose(out_f32, ref_f32, atol=2e-3, rtol=1e-3), "f32 mismatch"

    # bf16 MXU operands with f32 accumulation (recommended when N scales up).
    out_bf16 = jax.block_until_ready(
        rc_control_forward(Win, A, leak, b, dt, p, r,
                           compute_dtype=jnp.bfloat16))
    ref_bf16 = rc_control_reference(Win, A, leak, b, dt, p, r, jnp.bfloat16)
    assert out_bf16.shape == (N, K)
    assert jnp.allclose(out_bf16, ref_bf16, atol=2e-2, rtol=2e-2), "bf16 mismatch"

    print("KERNEL_OK")
</pallas_src>

<mosaic_0001>
module attributes {stable_mosaic.version = 11 : i64} {
  func.func @rc_kernel(%arg0: i32, %arg1: i32, %arg2: memref<128x144xf32, #tpu.memory_space<vmem>>, %arg3: memref<144x128xf32, #tpu.memory_space<vmem>>, %arg4: memref<128x128xf32, #tpu.memory_space<vmem>>, %arg5: memref<128x128xf32, #tpu.memory_space<vmem>>) attributes {dimension_semantics = [#tpu.dimension_semantics<parallel>, #tpu.dimension_semantics<parallel>], iteration_bounds = array<i64: 1, 2>, scalar_prefetch = 0 : i64, scratch_operands = 0 : i64, tpu.core_type = #tpu.core_type<tc>, window_params = [{transform_indices = @transform_0, window_bounds = array<i64: 128, 144>}, {transform_indices = @transform_1, window_bounds = array<i64: 144, 128>}, {transform_indices = @transform_2, window_bounds = array<i64: 128, 128>}, {transform_indices = @transform_3, window_bounds = array<i64: 128, 128>}]} {
    %c0 = arith.constant 0 : index
    %c0_0 = arith.constant 0 : index
    %0 = vector.load %arg2[%c0, %c0_0] : memref<128x144xf32, #tpu.memory_space<vmem>>, vector<128x144xf32>
    %c0_1 = arith.constant 0 : index
    %c0_2 = arith.constant 0 : index
    %1 = vector.load %arg3[%c0_1, %c0_2] : memref<144x128xf32, #tpu.memory_space<vmem>>, vector<144x128xf32>
    %cst = arith.constant dense<0.000000e+00> : vector<128x128xf32>
    %2 = tpu.matmul %0, %1, %cst {dimension_numbers = #tpu.dot_dimension_numbers<[1], [0], [0], [1], [0, 0, 1, 1], [], []>} : vector<128x144xf32>, vector<144x128xf32>, vector<128x128xf32> -> vector<128x128xf32>
    %c0_3 = arith.constant 0 : index
    %c0_4 = arith.constant 0 : index
    %3 = vector.load %arg4[%c0_3, %c0_4] : memref<128x128xf32, #tpu.memory_space<vmem>>, vector<128x128xf32>
    %cst_5 = arith.constant -4.500000e+01 : f32
    %4 = vector.broadcast %cst_5 : f32 to vector<128x128xf32>
    %5 = arith.mulf %4, %3 : vector<128x128xf32>
    %6 = math.tanh %2 : vector<128x128xf32>
    %cst_6 = arith.constant 4.500000e+01 : f32
    %7 = vector.broadcast %cst_6 : f32 to vector<128x128xf32>
    %8 = arith.mulf %7, %6 : vector<128x128xf32>
    %9 = arith.addf %5, %8 : vector<128x128xf32>
    %c0_7 = arith.constant 0 : index
    %c0_8 = arith.constant 0 : index
    %10 = vector.load %arg5[%c0_7, %c0_8] : memref<128x128xf32, #tpu.memory_space<vmem>>, vector<128x128xf32>
    tpu.vector_store %arg5[%c0_7, %c0_8], %9 {strides = array<i32>} : memref<128x128xf32, #tpu.memory_space<vmem>>, vector<128x128xf32>,
    return
  }
  func.func @transform_0(%arg0: i32, %arg1: i32) -> (i32, i32) {
    %c0_i32 = arith.constant 0 : i32
    %c0_i32_0 = arith.constant 0 : i32
    return %arg0, %c0_i32 : i32, i32
  }
  func.func @transform_1(%arg0: i32, %arg1: i32) -> (i32, i32) {
    %c0_i32 = arith.constant 0 : i32
    %c0_i32_0 = arith.constant 0 : i32
    return %c0_i32, %arg1 : i32, i32
  }
  func.func @transform_2(%arg0: i32, %arg1: i32) -> (i32, i32) {
    %c0_i32 = arith.constant 0 : i32
    return %arg0, %arg1 : i32, i32
  }
  func.func @transform_3(%arg0: i32, %arg1: i32) -> (i32, i32) {
    %c0_i32 = arith.constant 0 : i32
    return %arg0, %arg1 : i32, i32
  }
}

</mosaic_0001>

<bundles_post_ra>
// kernel: tpu_custom_call.1
= control target key start
LH: loop header
LB: loop body
LE: loop exit
PB: predicated region body
PF: predicated region fallthrough
CT: control target
= control target key end

     0   :  { %8 = vsyncpa [#allocation4], 0  ;;  %s1509_s0 = inlined_call_operand.vmem [shape: f32[128,144], index: 0, kind: input, shape index: {}]   ;;  %s1510_s1 = inlined_call_operand.vmem [shape: f32[144,256], index: 1, kind: input, shape index: {}]   ;;  %s1511_s2 = inlined_call_operand.hbm [shape: f32[128,256], index: 2, kind: input, shape index: {}]   ;;  %s1512_s3 = inlined_call_operand.hbm [shape: f32[128,256], index: 3, kind: output, shape index: {}]  }
   0x1   :  { %10 = vsyncpa [#allocation4 + $0x1], 0 }
   0x2   :  { %11 = vsyncpa [#allocation5], 0 }
   0x3   :  { %13 = vsyncpa [#allocation5 + $0x1], 0  ;;  %s1133_s12 = smov 0   ;;  %s1135_s13 = smov 0  }
   0x4   :  { %s1137_s14 = smov 0   ;;  %s1139_s15 = smov 0  }
   0x5   :  { %s1141_s16 = smov 0   ;;  %s1143_s17 = smov 0  }
   0x6 LB: > { %s831_s18 = sadd.s32 4294967295, %s1102_s17   ;;  %s832_s19 = sadd.s32 4294967294, %s1102_s17   ;;  %s1102_s17 = sphi %s1143_s17, %s19_s17   ;;  %s1098_s16 = sphi %s1141_s16, %s1521_s16   ;;  %s1094_s15 = sphi %s1139_s15, %s1520_s15   ;;  %s1090_s14 = sphi %s1137_s14, %s1519_s14   ;;  %s1086_s13 = sphi %s1135_s13, %s1518_s13   ;;  %s1082_s12 = sphi %s1133_s12, %s1517_s12  }
   0x7   : > { %s28_s20 = sadd.s32 1, %s1098_s16  ;;  %s64_s21 = sadd.s32 1, %s1090_s14 }
   0x8   : > { %p29_p0 = scmp.ge.s32.totalorder %s28_s20, 2  ;;  %p71_p1 = scmp.ne.s32.totalorder %s1090_s14, %s1086_s13 }
   0x9   : > { %p72_p2 = scmp.eq.s32.totalorder %s1102_s17, 0  ;;  %p105_p3 = scmp.ne.s32.totalorder %s1086_s13, %s1082_s12 }
   0xa   : > { %s1523_s20 = smov (%p29_p0, %s28_s20), 0  ;;  %p106_p5 = scmp.eq.s32.totalorder %s831_s18, 0 }
   0xb   : > { %p1174_p4 = por %p72_p2, %p71_p1  ;;  %s61_s23 = ssub.s32 %s1098_s16, %s1523_s20 }
   0xc   : > { %p131_p6 = scmp.eq.s32.totalorder %s831_s18, 1  ;;  %p62_p7 = scmp.eq.s32.totalorder %s61_s23, 0 }
   0xd   : > { %p1180_p8 = por %p106_p5, %p105_p3  ;;  %p137_p10 = scmp.eq.s32.totalorder %s832_s19, 1 }
   0xe   : > { %p1184_p9 = por %p131_p6, %p71_p1  ;;  %p835_p12 = scmp.ge.s32.totalorder %s1102_s17, 2 }
   0xf   : > { %s1189_s26 = scalar_select %p62_p7, %s1090_s14, %s64_s21  }
  0x10   : > { %p1191_p11 = por %p137_p10, %p105_p3  ;;  %163 = sbr.rel (%p835_p12) target bundleno = 51 (0x33), region = 20 }
  0x15   : > { %166 = sbr.rel (!%p1174_p4) target bundleno = 34 (0x22), region = 24  ;;  %s168_s28 = sand.u32 (%p1174_p4), 1, %s1090_s14  }
  0x16   : > { %s836_s29 = sshll.u32 (%p1174_p4), %s1098_s16, 3  ;;  %s898_s30 = smul.u32 (%p1174_p4), 144, %s168_s28 }
  0x17   : > { %s1205_s6 = scalar_lea.vmem (%p1174_p4), %s1510_s1, %s836_s29 }
  0x18   : > { %v235_v0 = vld [vmem:[%s1205_s6] sm:$0xff] (%p1174_p4)  ;;  %v237_v1 = vld [vmem:[%s1205_s6 + $0x10] sm:$0xff] (%p1174_p4)  ;;  %s170_s7 = scalar_lea.vmem (%p1174_p4), [#allocation2], %s898_s30 }
  0x19   : > { %v239_v2 = vld [vmem:[%s1205_s6 + $0x20] sm:$0xff] (%p1174_p4)  ;;  %v241_v3 = vld [vmem:[%s1205_s6 + $0x30] sm:$0xff] (%p1174_p4)  ;;  %236 = vst [vmem:[%s170_s7] sm:$0xff] (%p1174_p4), %v235_v0  ;;  %238 = vst [vmem:[%s170_s7 + $0x8] sm:$0xff] (%p1174_p4), %v237_v1 }
  0x1a   : > { %v243_v4 = vld [vmem:[%s1205_s6 + $0x40] sm:$0xff]  ;;  %v245_v5 = vld [vmem:[%s1205_s6 + $0x50] sm:$0xff]  ;;  %240 = vst [vmem:[%s170_s7 + $0x10] sm:$0xff] %v239_v2  ;;  %242 = vst [vmem:[%s170_s7 + $0x18] sm:$0xff] %v241_v3 }
  0x1b   : > { %244 = vst [vmem:[%s170_s7 + $0x20] sm:$0xff] %v243_v4  ;;  %246 = vst [vmem:[%s170_s7 + $0x28] sm:$0xff] %v245_v5  ;;  %v247_v6 = vld [vmem:[%s1205_s6 + $0x60] sm:$0xff]  ;;  %v249_v7 = vld [vmem:[%s1205_s6 + $0x70] sm:$0xff] }
  0x1c   : > { %v251_v8 = vld [vmem:[%s1205_s6 + $0x80] sm:$0xff]  ;;  %248 = vst [vmem:[%s170_s7 + $0x30] sm:$0xff] %v247_v6  ;;  %250 = vst [vmem:[%s170_s7 + $0x38] sm:$0xff] %v249_v7  ;;  %v253_v9 = vld [vmem:[%s1205_s6 + $0x90] sm:$0xff] }
  0x1d   : > { %252 = vst [vmem:[%s170_s7 + $0x40] sm:$0xff] %v251_v8  ;;  %v255_v10 = vld [vmem:[%s1205_s6 + $0xa0] sm:$0xff]  ;;  %v257_v11 = vld [vmem:[%s1205_s6 + $0xb0] sm:$0xff]  ;;  %254 = vst [vmem:[%s170_s7 + $0x48] sm:$0xff] %v253_v9 }
  0x1e   : > { %256 = vst [vmem:[%s170_s7 + $0x50] sm:$0xff] %v255_v10  ;;  %258 = vst [vmem:[%s170_s7 + $0x58] sm:$0xff] %v257_v11  ;;  %v259_v12 = vld [vmem:[%s1205_s6 + $0xc0] sm:$0xff]  ;;  %v261_v13 = vld [vmem:[%s1205_s6 + $0xd0] sm:$0xff] }
  0x1f   : > { %v263_v14 = vld [vmem:[%s1205_s6 + $0xe0] sm:$0xff]  ;;  %260 = vst [vmem:[%s170_s7 + $0x60] sm:$0xff] %v259_v12  ;;  %262 = vst [vmem:[%s170_s7 + $0x68] sm:$0xff] %v261_v13  ;;  %v265_v15 = vld [vmem:[%s1205_s6 + $0xf0] sm:$0xff] }
  0x20   : > { %264 = vst [vmem:[%s170_s7 + $0x70] sm:$0xff] %v263_v14  ;;  %v267_v16 = vld [vmem:[%s1205_s6 + $0x100] sm:$0xff]  ;;  %v269_v17 = vld [vmem:[%s1205_s6 + $0x110] sm:$0xff]  ;;  %266 = vst [vmem:[%s170_s7 + $0x78] sm:$0xff] %v265_v15 }
  0x21   : > { %268 = vst [vmem:[%s170_s7 + $0x80] sm:$0xff] %v267_v16  ;;  %270 = vst [vmem:[%s170_s7 + $0x88] sm:$0xff] %v269_v17 }
  0x22 PF: > { %s277_s8 = sand.u32 1, %s1090_s14   ;;  %s838_s9 = sshll.u32 %s1098_s16, 7 }
  0x23   : > { %s837_s10 = sshll.u32 %s277_s8, 7  ;;  %s289_s19 = scalar_lea.hbm %s1511_s2, %s838_s9 }
  0x24   : > { %s281_s21 = scalar_lea.vmem [#allocation3], %s837_s10  ;;  %s278_s28 = scalar_lea.sflag [#allocation4], %s277_s8 }
  0x25   : > { %s290_s23 = sshll.u32 %s281_s21, 4  ;;  %s1104_s30 = smov [#allocation3]   ;;  %s291_s23 = int_to_ptr.vmem [resolvable:$true] %s290_s23 }
  0x26   : > { %s1008_s29 = scalar_lea.vmem %s291_s23, 2048  ;;  %s1012_s4 = sshll.u32 %s1104_s30, 4  ;;  %s1013_s4 = int_to_ptr.vmem [resolvable:$false] %s1012_s4 }
  0x27   : > { %p1009_p13 = scmp.ne.s32.totalorder %s291_s23, %s1008_s29  ;;  %s1014_s5 = scalar_lea.vmem %s1013_s4, 4096 }
  0x28   : > { %p1015_p2 = scmp.lt.s32.totalorder %s291_s23, %s1013_s4  ;;  %p1016_p3 = scmp.lt.s32.totalorder %s1014_s5, %s1008_s29 }
  0x29   : > { %p1010_p0 = pnand %p1009_p13, %p1174_p4 }
  0x2a   : > { %p1017_p5 = por %p1016_p3, %p1015_p2 }
  0x2b   : > { %p1011_p1 = pneg %p1010_p0 }
  0x2d   : > { %p1018_p6 = pnand %p1017_p5, %p1011_p1 }
  0x2f   : > { %1021 = shalt.err (!%p1018_p6)
}
  0x30   : > { %s1105_s6 = smov 256   ;;  %s1106_s7 = smov 128  }
  0x31   : > { %s1107_s9 = smov 8  }
  0x32   : > { %900 = dma.hbm_to_vmem [thread:$0]  (%p1174_p4), %s289_s19, 2048, %s291_s23, %s278_s28, %s1105_s6, %s1106_s7, %s1107_s9  }
  0x33 PF: > { %p839_p7 = scmp.ge.s32.totalorder %s1102_s17, 1  ;;  %p298_p10 = scmp.lt.s32.totalorder %s1102_s17, 3 }
  0x35   : > { %p299_p13 = pnand %p839_p7, %p298_p10 }
  0x36   : > { %s1237_s8 = sand.u32 (!%p299_p13), 1, %s1086_s13  }
  0x37   : > { %302 = sbr.rel (%p299_p13) target bundleno = 354 (0x162), region = 66  ;;  %s840_s11 = sshll.u32 (!%p299_p13), %s1237_s8, 7 }
  0x38   : > { %s899_s10 = smul.u32 (!%p299_p13), 144, %s1237_s8  ;;  %s312_s22 = scalar_lea.sflag (!%p299_p13), [#allocation4], %s1237_s8 }
  0x39   : > { %s1246_s19 = scalar_lea.vmem (!%p299_p13), [#allocation3], %s840_s11 }
  0x3a   : > { %s1241_s18 = scalar_lea.vmem (!%p299_p13), [#allocation2], %s899_s10 }
  0x3c   : > { %1073 = dma.done.wait (%p1180_p8), %s312_s22, 2048  }
  0x3d   : > { %1075 = vsyncadd (%p1180_p8), %s312_s22, 4294965248  ;;  %v1108_v18 = vmov 0.0   ;;  %v404_v19 = vld [vmem:[%s1241_s18 + $0x78] sm:$0xff]  ;;  %v403_v20 = vld [vmem:[%s1241_s18 + $0x70] sm:$0xff]  ;;  %vm407_vm0 = vcmask 130048   ;;  %s1425_s6 = scalar_lea.vmem [#allocation6], %s840_s11 }
  0x3e   : > { %456 = vmatprep.subr.mxu0 %v1108_v18  ;;  %862 = vmatprep.subr.mxu1 %v1108_v18  ;;  %v402_v21 = vld [vmem:[%s1241_s18 + $0x68] sm:$0xff]  ;;  %v401_v22 = vld [vmem:[%s1241_s18 + $0x60] sm:$0xff]  ;;  %v400_v23 = vld [vmem:[%s1241_s18 + $0x58] sm:$0xff]  ;;  %s859_s11 = sshll.u32 %s1094_s15, 7  ;;  %s713_s7 = sshll.u32 %s1425_s6, 4  ;;  %s1459_s7 = int_to_ptr.vmem [resolvable:$true] %s713_s7 }
  0x3f   : > { %457 = vmatpush1.msra.mxu0 %v404_v19  ;;  %880 = vmatpush1.msra.mxu1 %v404_v19  ;;  %v399_v24 = vld [vmem:[%s1241_s18 + $0x50] sm:$0xff]  ;;  %v398_v25 = vld [vmem:[%s1241_s18 + $0x48] sm:$0xff]  ;;  %v397_v26 = vld [vmem:[%s1241_s18 + $0x40] sm:$0xff]  ;;  %s1457_s10 = scalar_lea.hbm %s1512_s3, %s859_s11  ;;  %s698_s15 = scalar_lea.sflag [#allocation5], %s1237_s8 }
  0x40   : > { %458 = vmatprep.subr.mxu0 %v1108_v18  ;;  %863 = vmatprep.subr.mxu1 %v1108_v18  ;;  %v396_v27 = vld [vmem:[%s1241_s18 + $0x38] sm:$0xff]  ;;  %v395_v28 = vld [vmem:[%s1241_s18 + $0x30] sm:$0xff]  ;;  %v394_v29 = vld [vmem:[%s1241_s18 + $0x28] sm:$0xff]  ;;  %s1109_s22 = smov [#allocation6]  }
  0x41   : > { %459 = vmatpush1.msra.mxu0 %v403_v20  ;;  %881 = vmatpush1.msra.mxu1 %v403_v20  ;;  %v393_v30 = vld [vmem:[%s1241_s18 + $0x20] sm:$0xff]  ;;  %v392_v31 = vld [vmem:[%s1241_s18 + $0x18] sm:$0xff]  ;;  %v391_v32 = vld [vmem:[%s1241_s18 + $0x10] sm:$0xff]  ;;  %s1026_s24 = sshll.u32 %s1109_s22, 4  ;;  %s1027_s24 = int_to_ptr.vmem [resolvable:$false] %s1026_s24 }
  0x42   : > { %460 = vmatprep.subr.mxu0 %v1108_v18  ;;  %864 = vmatprep.subr.mxu1 %v1108_v18  ;;  %v390_v33 = vld [vmem:[%s1241_s18 + $0x8] sm:$0xff]  ;;  %v389_v34 = vld [vmem:[%s1241_s18] sm:$0xff]  ;;  %s1028_s21 = scalar_lea.vmem %s1027_s24, 4096  ;;  %p1029_p1 = scmp.lt.s32.totalorder %s1459_s7, %s1027_s24 }
  0x43   : > { %461 = vmatpush1.msra.mxu0 %v402_v21  ;;  %882 = vmatpush1.msra.mxu1 %v402_v21  ;;  %v406_v35 = vld [vmem:[%s1241_s18 + $0x88] sm:$0xff]  ;;  %v405_v36 = vld [vmem:[%s1241_s18 + $0x80] sm:$0xff]  ;;  %s1022_s18 = scalar_lea.vmem %s1459_s7, 2048 }
  0x44   : > { %462 = vmatprep.subr.mxu0 %v1108_v18  ;;  %865 = vmatprep.subr.mxu1 %v1108_v18  ;;  %v358_v37 = vld [vmem:[%s1509_s0 + $0x8] sm:$0xff]  ;;  %v357_v39 = vld [vmem:[%s1509_s0] sm:$0xff]  ;;  %v360_v41 = vld [vmem:[%s1509_s0 + $0x18] sm:$0xff]  ;;  %p1023_p4 = scmp.ne.s32.totalorder %s1459_s7, %s1022_s18  ;;  %p1030_p2 = scmp.lt.s32.totalorder %s1028_s21, %s1022_s18 }
  0x45   : > { %463 = vmatpush1.msra.mxu0 %v401_v22  ;;  %883 = vmatpush1.msra.mxu1 %v401_v22  ;;  %v374_v38 = vld [vmem:[%s1509_s0 + $0x88] sm:$0xff]  ;;  %v373_v40 = vld [vmem:[%s1509_s0 + $0x80] sm:$0xff]  ;;  %v376_v42 = vld [vmem:[%s1509_s0 + $0x98] sm:$0xff] }
  0x46   : > { %464 = vmatprep.subr.mxu0 %v1108_v18  ;;  %866 = vmatprep.subr.mxu1 %v1108_v18  ;;  %v359_v43 = vld [vmem:[%s1509_s0 + $0x10] sm:$0xff]  ;;  %v362_v45 = vld [vmem:[%s1509_s0 + $0x28] sm:$0xff]  ;;  %v361_v47 = vld [vmem:[%s1509_s0 + $0x20] sm:$0xff]  ;;  %p1024_p8 = pnand %p1023_p4, %p1184_p9  ;;  %p1031_p3 = por %p1030_p2, %p1029_p1 }
  0x47   : > { %465 = vmatpush1.msra.mxu0 %v400_v23  ;;  %884 = vmatpush1.msra.mxu1 %v400_v23  ;;  %v375_v44 = vld [vmem:[%s1509_s0 + $0x90] sm:$0xff]  ;;  %v378_v46 = vld [vmem:[%s1509_s0 + $0xa8] sm:$0xff]  ;;  %v377_v48 = vld [vmem:[%s1509_s0 + $0xa0] sm:$0xff] }
  0x48   : > { %466 = vmatprep.subr.mxu0 %v1108_v18  ;;  %867 = vmatprep.subr.mxu1 %v1108_v18  ;;  %v364_v49 = vld [vmem:[%s1509_s0 + $0x38] sm:$0xff]  ;;  %v363_v51 = vld [vmem:[%s1509_s0 + $0x30] sm:$0xff]  ;;  %v366_v53 = vld [vmem:[%s1509_s0 + $0x48] sm:$0xff]  ;;  %p1025_p0 = pneg %p1024_p8 }
  0x49   : > { %467 = vmatpush1.msra.mxu0 %v399_v24  ;;  %885 = vmatpush1.msra.mxu1 %v399_v24  ;;  %v380_v50 = vld [vmem:[%s1509_s0 + $0xb8] sm:$0xff]  ;;  %v379_v52 = vld [vmem:[%s1509_s0 + $0xb0] sm:$0xff]  ;;  %v382_v54 = vld [vmem:[%s1509_s0 + $0xc8] sm:$0xff] }
  0x4a   : > { %468 = vmatprep.subr.mxu0 %v1108_v18  ;;  %868 = vmatprep.subr.mxu1 %v1108_v18  ;;  %v365_v55 = vld [vmem:[%s1509_s0 + $0x40] sm:$0xff]  ;;  %v368_v57 = vld [vmem:[%s1509_s0 + $0x58] sm:$0xff]  ;;  %v367_v59 = vld [vmem:[%s1509_s0 + $0x50] sm:$0xff]  ;;  %p1032_p5 = pnand %p1031_p3, %p1025_p0 }
  0x4b   : > { %469 = vmatpush1.msra.mxu0 %v398_v25  ;;  %886 = vmatpush1.msra.mxu1 %v398_v25  ;;  %v381_v56 = vld [vmem:[%s1509_s0 + $0xc0] sm:$0xff]  ;;  %v384_v58 = vld [vmem:[%s1509_s0 + $0xd8] sm:$0xff]  ;;  %v383_v60 = vld [vmem:[%s1509_s0 + $0xd0] sm:$0xff] }
  0x4c   : > { %470 = vmatprep.subr.mxu0 %v1108_v18  ;;  %869 = vmatprep.subr.mxu1 %v1108_v18  ;;  %v370_v61 = vld [vmem:[%s1509_s0 + $0x68] sm:$0xff]  ;;  %v369_v63 = vld [vmem:[%s1509_s0 + $0x60] sm:$0xff]  ;;  %v372_v1 = vld [vmem:[%s1509_s0 + $0x78] sm:$0xff] }
  0x4d   : > { %471 = vmatpush1.msra.mxu0 %v397_v26  ;;  %887 = vmatpush1.msra.mxu1 %v397_v26  ;;  %v386_v62 = vld [vmem:[%s1509_s0 + $0xe8] sm:$0xff]  ;;  %v385_v0 = vld [vmem:[%s1509_s0 + $0xe0] sm:$0xff]  ;;  %v388_v2 = vld [vmem:[%s1509_s0 + $0xf8] sm:$0xff] }
  0x4e   : > { %472 = vmatprep.subr.mxu0 %v1108_v18  ;;  %870 = vmatprep.subr.mxu1 %v1108_v18  ;;  %v371_v3 = vld [vmem:[%s1509_s0 + $0x70] sm:$0xff]  ;;  %v601_v15 = vld [vmem:[%s1246_s19] sm:$0xff]  ;;  %v602_v24 = vld [vmem:[%s1246_s19 + $0x8] sm:$0xff] }
  0x4f   : > { %473 = vmatpush1.msra.mxu0 %v396_v27  ;;  %888 = vmatpush1.msra.mxu1 %v396_v27  ;;  %v387_v4 = vld [vmem:[%s1509_s0 + $0xf0] sm:$0xff]  ;;  %v617_v21 = vmul.f32 -45.0, %v601_v15 }
  0x50   : > { %474 = vmatprep.subr.mxu0 %v1108_v18  ;;  %871 = vmatprep.subr.mxu1 %v1108_v18 }
  0x51   : > { %475 = vmatpush1.msra.mxu0 %v395_v28  ;;  %889 = vmatpush1.msra.mxu1 %v395_v28 }
  0x52   : > { %476 = vmatprep.subr.mxu0 %v1108_v18  ;;  %872 = vmatprep.subr.mxu1 %v1108_v18 }
  0x53   : > { %477 = vmatpush1.msra.mxu0 %v394_v29  ;;  %890 = vmatpush1.msra.mxu1 %v394_v29  ;;  %v610_v29 = vld [vmem:[%s1246_s19 + $0x48] sm:$0xff] }
  0x54   : > { %478 = vmatprep.subr.mxu0 %v1108_v18  ;;  %873 = vmatprep.subr.mxu1 %v1108_v18 }
  0x55   : > { %479 = vmatpush1.msra.mxu0 %v393_v30  ;;  %891 = vmatpush1.msra.mxu1 %v393_v30 }
  0x56   : > { %480 = vmatprep.subr.mxu0 %v1108_v18  ;;  %874 = vmatprep.subr.mxu1 %v1108_v18 }
  0x57   : > { %481 = vmatpush1.msra.mxu0 %v392_v31  ;;  %892 = vmatpush1.msra.mxu1 %v392_v31 }
  0x58   : > { %482 = vmatprep.subr.mxu0 %v1108_v18  ;;  %875 = vmatprep.subr.mxu1 %v1108_v18 }
  0x59   : > { %483 = vmatpush1.msra.mxu0 %v391_v32  ;;  %893 = vmatpush1.msra.mxu1 %v391_v32 }
  0x5a   : > { %484 = vmatprep.subr.mxu0 %v1108_v18  ;;  %876 = vmatprep.subr.mxu1 %v1108_v18 }
  0x5b   : > { %485 = vmatpush1.msra.mxu0 %v390_v33  ;;  %894 = vmatpush1.msra.mxu1 %v390_v33 }
  0x5c   : > { %486 = vmatprep.subr.mxu0 %v1108_v18  ;;  %877 = vmatprep.subr.mxu1 %v1108_v18 }
  0x5d   : > { %487 = vmatpush1.msra.mxu0 %v389_v34  ;;  %895 = vmatpush1.msra.mxu1 %v389_v34  ;;  %v618_v34 = vmul.f32 -45.0, %v602_v24 }
  0x5e   : > { %516 = vmatprep.subr.mxu0 %v1108_v18  ;;  %878 = vmatprep.subr.mxu1 %v1108_v18 }
  0x5f   : > { %517 = vmatpush2.msra.mxu0 %v406_v35  ;;  %896 = vmatpush2.msra.mxu1 %v406_v35 }
  0x60   : > { %518 = vmatprep.subr.mxu0 %v1108_v18  ;;  %879 = vmatprep.subr.mxu1 %v1108_v18  ;;  %v609_v18 = vld [vmem:[%s1246_s19 + $0x40] sm:$0xff] }
  0x61   : > { %519 = vmatpush2.msra.mxu0 %v405_v36  ;;  %897 = vmatpush2.msra.mxu1 %v405_v36  ;;  %v625_v23 = vmul.f32 -45.0, %v609_v18 }
  0x62   : > { %842 = vmatprep.mubr.msk.f32.mxu0 %vm407_vm0, %v358_v37  ;;  %850 = vmatprep.mubr.msk.f32.mxu1 %vm407_vm0, %v374_v38  ;;  %v626_v37 = vmul.f32 -45.0, %v610_v29  ;;  %v603_v38 = vld [vmem:[%s1246_s19 + $0x10] sm:$0xff] }
  0x63   : > { %521 = vmatmul.mubr.f32.vlgmr.msra.gmra.mxu0 %v357_v39  ;;  %561 = vmatmul.mubr.f32.vlgmr.msra.gmra.mxu1 %v373_v40 }
  0x64   : > { %843 = vmatprep.mubr.msk.f32.mxu0 %vm407_vm0, %v360_v41  ;;  %851 = vmatprep.mubr.msk.f32.mxu1 %vm407_vm0, %v376_v42 }
  0x67   : > { %526 = vmatmul.mubr.f32.gmra.mxu0 %v359_v43  ;;  %566 = vmatmul.mubr.f32.gmra.mxu1 %v375_v44  ;;  %v611_v43 = vld [vmem:[%s1246_s19 + $0x50] sm:$0xff] }
  0x68   : > { %844 = vmatprep.mubr.msk.f32.mxu0 %vm407_vm0, %v362_v45  ;;  %852 = vmatprep.mubr.msk.f32.mxu1 %vm407_vm0, %v378_v46 }
  0x6b   : > { %531 = vmatmul.mubr.f32.gmra.mxu0 %v361_v47  ;;  %571 = vmatmul.mubr.f32.gmra.mxu1 %v377_v48  ;;  %v619_v48 = vmul.f32 -45.0, %v603_v38  ;;  %v608_v38 = vld [vmem:[%s1246_s19 + $0x38] sm:$0xff] }
  0x6c   : > { %845 = vmatprep.mubr.msk.f32.mxu0 %vm407_vm0, %v364_v49  ;;  %853 = vmatprep.mubr.msk.f32.mxu1 %vm407_vm0, %v380_v50 }
  0x6f   : > { %536 = vmatmul.mubr.f32.gmra.mxu0 %v363_v51  ;;  %576 = vmatmul.mubr.f32.gmra.mxu1 %v379_v52  ;;  %v627_v51 = vmul.f32 -45.0, %v611_v43  ;;  %v604_v52 = vld [vmem:[%s1246_s19 + $0x18] sm:$0xff] }
  0x70   : > { %846 = vmatprep.mubr.msk.f32.mxu0 %vm407_vm0, %v366_v53  ;;  %854 = vmatprep.mubr.msk.f32.mxu1 %vm407_vm0, %v382_v54 }
  0x73   : > { %541 = vmatmul.mubr.f32.gmra.mxu0 %v365_v55  ;;  %581 = vmatmul.mubr.f32.gmra.mxu1 %v381_v56 }
  0x74   : > { %847 = vmatprep.mubr.msk.f32.mxu0 %vm407_vm0, %v368_v57  ;;  %855 = vmatprep.mubr.msk.f32.mxu1 %vm407_vm0, %v384_v58  ;;  %v612_v57 = vld [vmem:[%s1246_s19 + $0x58] sm:$0xff] }
  0x77   : > { %546 = vmatmul.mubr.f32.gmra.mxu0 %v367_v59  ;;  %586 = vmatmul.mubr.f32.gmra.mxu1 %v383_v60 }
  0x78   : > { %848 = vmatprep.mubr.msk.f32.mxu0 %vm407_vm0, %v370_v61  ;;  %856 = vmatprep.mubr.msk.f32.mxu1 %vm407_vm0, %v386_v62  ;;  %v620_v62 = vmul.f32 -45.0, %v604_v52 }
  0x7b   : > { %551 = vmatmul.mubr.f32.gmra.mxu0 %v369_v63  ;;  %591 = vmatmul.mubr.f32.gmra.mxu1 %v385_v0 }
  0x7c   : > { %849 = vmatprep.mubr.msk.f32.mxu0 %vm407_vm0, %v372_v1  ;;  %857 = vmatprep.mubr.msk.f32.mxu1 %vm407_vm0, %v388_v2  ;;  %v628_v1 = vmul.f32 -45.0, %v612_v57  ;;  %v605_v2 = vld [vmem:[%s1246_s19 + $0x20] sm:$0xff] }
  0x7f   : > { %556 = vmatmul.mubr.f32.gmra.mxu0 %v371_v3  ;;  %596 = vmatmul.mubr.f32.gmra.mxu1 %v387_v4 }
 0x123   : > { %v522_v5 = vpop.f32.mrf.mxu0  ;;  %v562_v6 = vpop.f32.mrf.mxu1 }
 0x124   : > { %964 = vtanh.f32 %v522_v5 }
 0x125   : > { %966 = vtanh.f32 %v562_v6  ;;  %v524_v7 = vpop.f32.mrf.mxu0  ;;  %v564_v8 = vpop.f32.mrf.mxu1 }
 0x126   : > { %v613_v7 = vld [vmem:[%s1246_s19 + $0x60] sm:$0xff] }
 0x127   : > { %v527_v9 = vpop.f32.mrf.mxu0  ;;  %v567_v10 = vpop.f32.mrf.mxu1  ;;  %v629_v15 = vmul.f32 -45.0, %v613_v7 }
 0x128   : > { %968 = vtanh.f32 %v527_v9 }
 0x129   : > { %970 = vtanh.f32 %v567_v10  ;;  %v529_v11 = vpop.f32.mrf.mxu0  ;;  %v569_v12 = vpop.f32.mrf.mxu1 }
 0x12a   : > { %v621_v12 = vmul.f32 -45.0, %v605_v2 }
 0x12b   : > { %v532_v13 = vpop.f32.mrf.mxu0  ;;  %v572_v14 = vpop.f32.mrf.mxu1 }
 0x12c   : > { %972 = vtanh.f32 %v532_v13 }
 0x12d   : > { %974 = vtanh.f32 %v572_v14  ;;  %v534_v16 = vpop.f32.mrf.mxu0  ;;  %v574_v17 = vpop.f32.mrf.mxu1 }
 0x12e   : > { %v606_v16 = vld [vmem:[%s1246_s19 + $0x28] sm:$0xff] }
 0x12f   : > { %v537_v19 = vpop.f32.mrf.mxu0  ;;  %v577_v20 = vpop.f32.mrf.mxu1  ;;  %v622_v24 = vmul.f32 -45.0, %v606_v16 }
 0x130   : > { %976 = vtanh.f32 %v537_v19 }
 0x131   : > { %v965_v22 = vpop.eup %964  ;;  %978 = vtanh.f32 %v577_v20  ;;  %v539_v25 = vpop.f32.mrf.mxu0 }
 0x132   : > { %v579_v26 = vpop.f32.mrf.mxu1  ;;  %v967_v27 = vpop.eup %966  ;;  %v649_v28 = vmul.f32 45.0, %v965_v22 }
 0x133   : > { %v657_v30 = vmul.f32 45.0, %v967_v27  ;;  %v542_v31 = vpop.f32.mrf.mxu0 }
 0x134   : > { %v582_v32 = vpop.f32.mrf.mxu1  ;;  %v665_v33 = vadd.f32 %v649_v28, %v617_v21  ;;  %980 = vtanh.f32 %v542_v31  ;;  %v614_v21 = vld [vmem:[%s1246_s19 + $0x68] sm:$0xff]  ;;  %v607_v28 = vld [vmem:[%s1246_s19 + $0x30] sm:$0xff] }
 0x135   : > { %v969_v35 = vpop.eup %968  ;;  %v673_v36 = vadd.f32 %v657_v30, %v625_v23  ;;  %982 = vtanh.f32 %v582_v32  ;;  %v544_v39 = vpop.f32.mrf.mxu0  ;;  %v630_v27 = vmul.f32 -45.0, %v614_v21  ;;  %v615_v31 = vld [vmem:[%s1246_s19 + $0x70] sm:$0xff] }
 0x136   : > { %v584_v40 = vpop.f32.mrf.mxu1  ;;  %v971_v41 = vpop.eup %970  ;;  %681 = vst [vmem:[%s1425_s6] sm:$0xff] %v665_v33  ;;  %v650_v42 = vmul.f32 45.0, %v969_v35 }
 0x137   : > { %689 = vst [vmem:[%s1425_s6 + $0x40] sm:$0xff] %v673_v36  ;;  %v658_v44 = vmul.f32 45.0, %v971_v41  ;;  %v547_v45 = vpop.f32.mrf.mxu0  ;;  %v616_v41 = vld [vmem:[%s1246_s19 + $0x78] sm:$0xff] }
 0x138   : > { %v587_v46 = vpop.f32.mrf.mxu1  ;;  %v666_v47 = vadd.f32 %v650_v42, %v618_v34  ;;  %984 = vtanh.f32 %v547_v45  ;;  %v623_v34 = vmul.f32 -45.0, %v607_v28 }
 0x139   : > { %v973_v49 = vpop.eup %972  ;;  %v674_v50 = vadd.f32 %v658_v44, %v626_v37  ;;  %986 = vtanh.f32 %v587_v46  ;;  %v549_v53 = vpop.f32.mrf.mxu0  ;;  %v631_v37 = vmul.f32 -45.0, %v615_v31  ;;  %v624_v44 = vmul.f32 -45.0, %v608_v38 }
 0x13a   : > { %v589_v54 = vpop.f32.mrf.mxu1  ;;  %v975_v55 = vpop.eup %974  ;;  %682 = vst [vmem:[%s1425_s6 + $0x8] sm:$0xff] %v666_v47  ;;  %v651_v56 = vmul.f32 45.0, %v973_v49  ;;  %v632_v47 = vmul.f32 -45.0, %v616_v41 }
 0x13b   : > { %690 = vst [vmem:[%s1425_s6 + $0x48] sm:$0xff] %v674_v50  ;;  %v659_v58 = vmul.f32 45.0, %v975_v55  ;;  %v552_v59 = vpop.f32.mrf.mxu0 }
 0x13c   : > { %v592_v60 = vpop.f32.mrf.mxu1  ;;  %v667_v61 = vadd.f32 %v651_v56, %v619_v48  ;;  %988 = vtanh.f32 %v552_v59 }
 0x13d   : > { %v977_v63 = vpop.eup %976  ;;  %v675_v0 = vadd.f32 %v659_v58, %v627_v51  ;;  %990 = vtanh.f32 %v592_v60  ;;  %v554_v3 = vpop.f32.mrf.mxu0 }
 0x13e   : > { %v594_v4 = vpop.f32.mrf.mxu1  ;;  %v979_v5 = vpop.eup %978  ;;  %683 = vst [vmem:[%s1425_s6 + $0x10] sm:$0xff] %v667_v61  ;;  %v652_v6 = vmul.f32 45.0, %v977_v63 }
 0x13f   : > { %691 = vst [vmem:[%s1425_s6 + $0x50] sm:$0xff] %v675_v0  ;;  %v660_v8 = vmul.f32 45.0, %v979_v5  ;;  %v557_v9 = vpop.f32.mrf.mxu0 }
 0x140   : > { %v597_v10 = vpop.f32.mrf.mxu1  ;;  %v668_v11 = vadd.f32 %v652_v6, %v620_v62  ;;  %992 = vtanh.f32 %v557_v9 }
 0x141   : > { %v981_v13 = vpop.eup %980  ;;  %v676_v14 = vadd.f32 %v660_v8, %v628_v1  ;;  %994 = vtanh.f32 %v597_v10  ;;  %v559_v17 = vpop.f32.mrf.mxu0 }
 0x142   : > { %v599_v18 = vpop.f32.mrf.mxu1  ;;  %v983_v19 = vpop.eup %982  ;;  %684 = vst [vmem:[%s1425_s6 + $0x18] sm:$0xff] %v668_v11  ;;  %v653_v20 = vmul.f32 45.0, %v981_v13 }
 0x143   : > { %692 = vst [vmem:[%s1425_s6 + $0x58] sm:$0xff] %v676_v14  ;;  %v661_v22 = vmul.f32 45.0, %v983_v19 }
 0x144   : > { %v669_v23 = vadd.f32 %v653_v20, %v621_v12 }
 0x145   : > { %v985_v25 = vpop.eup %984  ;;  %v677_v26 = vadd.f32 %v661_v22, %v629_v15 }
 0x146   : > { %v987_v29 = vpop.eup %986  ;;  %685 = vst [vmem:[%s1425_s6 + $0x20] sm:$0xff] %v669_v23  ;;  %v654_v30 = vmul.f32 45.0, %v985_v25 }
 0x147   : > { %693 = vst [vmem:[%s1425_s6 + $0x60] sm:$0xff] %v677_v26  ;;  %v662_v32 = vmul.f32 45.0, %v987_v29 }
 0x148   : > { %v670_v33 = vadd.f32 %v654_v30, %v622_v24 }
 0x149   : > { %v989_v35 = vpop.eup %988  ;;  %v678_v36 = vadd.f32 %v662_v32, %v630_v27 }
 0x14a   : > { %v991_v39 = vpop.eup %990  ;;  %686 = vst [vmem:[%s1425_s6 + $0x28] sm:$0xff] %v670_v33  ;;  %v655_v40 = vmul.f32 45.0, %v989_v35 }
 0x14b   : > { %694 = vst [vmem:[%s1425_s6 + $0x68] sm:$0xff] %v678_v36  ;;  %v663_v42 = vmul.f32 45.0, %v991_v39 }
 0x14c   : > { %v671_v43 = vadd.f32 %v655_v40, %v623_v34 }
 0x14d   : > { %v993_v45 = vpop.eup %992  ;;  %v679_v46 = vadd.f32 %v663_v42, %v631_v37 }
 0x14e   : > { %v995_v48 = vpop.eup %994  ;;  %687 = vst [vmem:[%s1425_s6 + $0x30] sm:$0xff] %v671_v43  ;;  %v656_v49 = vmul.f32 45.0, %v993_v45 }
 0x14f   : > { %695 = vst [vmem:[%s1425_s6 + $0x70] sm:$0xff] %v679_v46  ;;  %v664_v50 = vmul.f32 45.0, %v995_v48 }
 0x150   : > { %v672_v51 = vadd.f32 %v656_v49, %v624_v44 }
 0x151   : > { %v680_v52 = vadd.f32 %v664_v50, %v632_v47 }
 0x152   : > { %688 = vst [vmem:[%s1425_s6 + $0x38] sm:$0xff] %v672_v51 }
 0x153   : > { %696 = vst [vmem:[%s1425_s6 + $0x78] sm:$0xff] %v680_v52 }
 0x154   : > { %1035 = shalt.err (!%p1032_p5)
}
 0x155   : > { %s1036_s23 = scalar_lea.hbm %s1457_s10, 2048  ;;  %s1040_s30 = scalar_lea.hbm %s1512_s3, 4096 }
 0x156   : > { %p1037_p6 = scmp.ne.s32.totalorder %s1457_s10, %s1036_s23  ;;  %p1041_p13 = scmp.lt.s32.totalorder %s1457_s10, %s1512_s3 }
 0x157   : > { %p1042_p4 = scmp.lt.s32.totalorder %s1040_s30, %s1036_s23 }
 0x158   : > { %p1038_p7 = pnand %p1037_p6, %p1184_p9 }
 0x159   : > { %p1043_p8 = por %p1042_p4, %p1041_p13 }
 0x15a   : > { %p1039_p10 = pneg %p1038_p7 }
 0x15c   : > { %p1044_p0 = pnand %p1043_p8, %p1039_p10 }
 0x15e   : > { %1047 = shalt.err (!%p1044_p0)
}
 0x15f   : > { %s1110_s6 = smov 128   ;;  %s1111_s11 = smov 256  }
 0x160   : > { %s1112_s9 = smov 8  }
 0x161   : > { %902 = dma.vmem_to_hbm [thread:$0]  (%p1184_p9), %s1459_s7, 2048, %s1457_s10, %s698_s15, %s1110_s6, %s1111_s11, %s1112_s9  }
 0x162 PF: > { %s728_s19 = sand.u32 1, %s1082_s12   ;;  %p905_p1 = pnand %p835_p12, %p1191_p11 }
 0x163   : > { %s729_s18 = scalar_lea.sflag [#allocation5], %s728_s19 }
 0x164   : > { %p906_p2 = pneg %p905_p1 }
 0x166   : > { %1077 = dma.done.wait (%p906_p2), %s729_s18, 2048  }
 0x167   : > { %1079 = vsyncadd (%p906_p2), %s729_s18, 4294965248  ;;  %s19_s17 = sadd.s32 1, %s1102_s17   ;;  %s1517_s12 = smov %s1086_s13 }
 0x168   : > { %p16_p3 = scmp.ge.s32.totalorder %s19_s17, 4   ;;  %s1518_s13 = smov %s1090_s14 }
 0x169   : > { %s1519_s14 = smov %s1189_s26  ;;  %s1520_s15 = smov %s1098_s16 }
 0x16a   : > { %s1521_s16 = smov %s1523_s20  ;;  %18 = sbr.rel (!%p16_p3) target bundleno = 6 (0x6), region = 126 }
 0x16f   :  { %734 = vsyncpa [#allocation4], 1 }
 0x170   :  { %736 = vsyncpa [#allocation4 + $0x1], 1 }
 0x171   :  { %737 = vsyncpa [#allocation5], 1 }
 0x172   :  { %739 = vsyncpa [#allocation5 + $0x1], 1 }

</bundles_post_ra>
